<compile_context>
chip_gen: v5e
topology: v5e:2x2
jax: 0.10.0
libtpu: 0.0.40
codegen_flags: <defaults>
</compile_context>

<pallas_src>
import functools

import jax
import jax.numpy as jnp
from jax import lax
from jax.experimental import pallas as pl
from jax.experimental.pallas import tpu as pltpu


def _round_up(x: int, m: int) -> int:
    return (x + m - 1) // m * m


def _pick_tile(n: int, candidates) -> int:
    for c in candidates:
        if n % c == 0:
            return c
    return n


def _vmem_limit(block_bytes: int) -> int:
    # Explicit scoped-VMEM budget with headroom, capped so the same kernel
    # still fits v7x's 64 MiB physical VMEM.
    return int(min(max(block_bytes + (2 << 20), 32 << 20), 48 << 20))


# ---------------------------------------------------------------------------
# Phases 1 & 3: out = x @ w + b, rows / output-columns tiled, fully parallel.
# ---------------------------------------------------------------------------
def _matmul_bias_kernel(x_ref, w_ref, b_ref, o_ref):
    x = x_ref[...].astype(w_ref.dtype)            # per-tile cast, hidden under DMA
    acc = jnp.dot(x, w_ref[...], preferred_element_type=jnp.float32)
    o_ref[...] = (acc + b_ref[...]).astype(o_ref.dtype)


def _matmul_bias(x2d, w, b2d, *, out_dtype=jnp.float32):
    """(M, K) @ (K, N) + (1, N) -> (M, N).

    Caller guarantees M % 8 == 0 and N % 128 == 0 (or N small enough to use as
    a full-extent block).  Grid is (N/tn, M/tm) with the ROW axis innermost so
    the larger (K, tn) weight tile stays VMEM-resident across the row sweep
    (Pallas skips the re-fetch when the block index is unchanged)."""
    M, K = x2d.shape
    K2, N = w.shape
    assert K2 == K and b2d.shape == (1, N)
    tm = _pick_tile(M, (512, 256, 128, 64, 32, 16, 8))
    tn = _pick_tile(N, (1024, 512, 384, 256, 128))
    w_bytes = jnp.dtype(w.dtype).itemsize
    blk = 2 * (tm * K * 4 + K * tn * w_bytes + tn * 4 + tm * tn * 4)

    return pl.pallas_call(
        _matmul_bias_kernel,
        out_shape=jax.ShapeDtypeStruct((M, N), out_dtype),
        grid_spec=pltpu.PrefetchScalarGridSpec(
            num_scalar_prefetch=0,
            grid=(N // tn, M // tm),                       # rows innermost
            in_specs=[
                pl.BlockSpec((tm, K), lambda j, i: (i, 0)),
                pl.BlockSpec((K, tn), lambda j, i: (0, j)),  # held across i
                pl.BlockSpec((1, tn), lambda j, i: (0, j)),
            ],
            out_specs=pl.BlockSpec((tm, tn), lambda j, i: (i, j)),
        ),
        compiler_params=pltpu.CompilerParams(
            dimension_semantics=("parallel", "parallel"),
            vmem_limit_bytes=_vmem_limit(blk),
        ),
    )(x2d, w, b2d)


# ---------------------------------------------------------------------------
# Phase 2: the sequential GRU recurrence, chunked over (batch, time).
# ---------------------------------------------------------------------------
def _gru_recurrent_kernel(gx_ref, whh_ref, bhhn_ref, hall_ref, hlast_ref,
                          h_carry, *, seq_len, time_chunk, mask_tail):
    """gx_ref    : (Tc, Bc, 3H) precomputed X@W_ih^T + b_ih (+ b_hh for r,z)
       whh_ref   : (H, 3H)      transposed weight_hh_l0 (VMEM resident)
       bhhn_ref  : (1, H)       b_hh for the n-gate (stays inside r*(...))
       hall_ref  : (Tc, Bc, H)  hidden states of this chunk (fed to the head)
       hlast_ref : (1, Bc, H)   final hidden state (PyTorch GRU `hidden`)
       h_carry   : (Bc, H) VMEM scratch carrying h across time chunks."""
    Tc, Bc, three_h = gx_ref.shape
    H = three_h // 3

    # hidden=None in PyTorch -> zero initial state at the start of every
    # batch chunk's time sweep.
    @pl.when(pl.program_id(1) == 0)
    def _():
        h_carry[...] = jnp.zeros_like(h_carry)

    # Hoisted out of the serial loop (JAX does not CSE broadcast_in_dim).
    bhh_n = jnp.broadcast_to(bhhn_ref[...], (Bc, H))
    t0 = pl.program_id(1) * time_chunk

    def step(i, h_prev):
        gx = gx_ref[i]                                        # (Bc, 3H) [r|z|n]
        gh = jnp.dot(h_prev.astype(whh_ref.dtype), whh_ref[...],
                     preferred_element_type=jnp.float32)      # (Bc, 3H)
        r = jax.nn.sigmoid(gx[:, :H] + gh[:, :H])
        z = jax.nn.sigmoid(gx[:, H:2 * H] + gh[:, H:2 * H])
        n = jnp.tanh(gx[:, 2 * H:] + r * (gh[:, 2 * H:] + bhh_n))
        h_new = (1.0 - z) * n + z * h_prev
        hall_ref[i] = h_new
        if mask_tail:                        # static: only when Tp > T
            h_new = jnp.where(t0 + i < seq_len, h_new, h_prev)
        return h_new

    h_last = lax.fori_loop(0, Tc, step, h_carry[...])
    h_carry[...] = h_last            # carried to the next time chunk
    hlast_ref[0] = h_last            # block resident across t; final value wins


# ---------------------------------------------------------------------------
# One-time parameter preparation (kept OUT of the per-call path).
# ---------------------------------------------------------------------------
def prepare_vae_decoder_params(w_ih, w_hh, b_ih, b_hh, w_fc, b_fc,
                               param_dtype=jnp.float32):
    H = w_hh.shape[1]
    V = w_fc.shape[0]
    Vp = _round_up(V, 128)
    f32 = jnp.float32
    # r/z gates absorb both biases up front (plain sum inside the sigmoid);
    # the n-gate's b_hh stays in the recurrence because it is scaled by r.
    bias_gx = (b_ih + jnp.concatenate(
        [b_hh[:2 * H], jnp.zeros((H,), b_hh.dtype)])).astype(f32)
    return dict(
        w_ih_t=jnp.transpose(w_ih).astype(param_dtype),            # (L, 3H)
        w_hh_t=jnp.transpose(w_hh).astype(param_dtype),            # (H, 3H)
        bias_gx=bias_gx.reshape(1, 3 * H),                         # (1, 3H) f32
        b_hh_n=b_hh[2 * H:].astype(f32).reshape(1, H),             # (1, H)  f32
        w_fc_t=jnp.pad(jnp.transpose(w_fc),
                       ((0, 0), (0, Vp - V))).astype(param_dtype), # (H, Vp)
        b_fc_p=jnp.pad(b_fc, ((0, Vp - V),)).astype(f32).reshape(1, Vp),
    )


# ---------------------------------------------------------------------------
# Wrapper: equivalent of VAEDecoder.forward(x) (hidden arg is ignored by the
# module, so the initial state is zeros).
# ---------------------------------------------------------------------------
@functools.partial(jax.jit, static_argnames=("n_vocab",))
def vae_decoder_forward(x, params, n_vocab):
    f32 = jnp.float32
    B, T, L = x.shape
    w_ih_t, w_hh_t = params["w_ih_t"], params["w_hh_t"]
    bias_gx, b_hh_n = params["bias_gx"], params["b_hh_n"]
    w_fc_t, b_fc_p = params["w_fc_t"], params["b_fc_p"]
    H = w_hh_t.shape[0]
    Vp = w_fc_t.shape[1]

    # Sublane-granule batch padding (8 for the f32 recurrence) and a time
    # chunk bounded so the recurrence's VMEM footprint stays small.
    Bp = _round_up(B, 8)
    Tc = min(64, _round_up(T, 8))
    Tp = _round_up(T, Tc)
    Bc = min(Bp, 8)                      # per-step working set fits the vregs

    # Time-major activations; this transpose touches the SMALLEST tensor.
    x_tm = jnp.transpose(x, (1, 0, 2)).astype(f32)
    x_tm = jnp.pad(x_tm, ((0, Tp - T), (0, Bp - B), (0, 0)))

    # ---- Phase 1: input projection for all Tp*Bp rows at once. ----
    # TODO(synk): store gx in bf16 once precision is validated to halve its
    # HBM writeback + phase-2 read traffic.
    gx = _matmul_bias(x_tm.reshape(Tp * Bp, L), w_ih_t, bias_gx,
                      out_dtype=f32).reshape(Tp, Bp, 3 * H)

    # ---- Phase 2: chunked sequential recurrence. ----
    whh_bytes = jnp.dtype(w_hh_t.dtype).itemsize
    blk = (2 * Tc * Bc * 3 * H * 4 + 2 * Tc * Bc * H * 4     # gx + h_all blocks
           + 2 * H * 3 * H * whh_bytes                        # W_hh
           + 3 * Bc * H * 4 + 2 * H * 4)                      # h_last/carry/bias
    kernel = functools.partial(_gru_recurrent_kernel, seq_len=T,
                               time_chunk=Tc, mask_tail=(Tp != T))
    h_all, h_last = pl.pallas_call(
        kernel,
        out_shape=(jax.ShapeDtypeStruct((Tp, Bp, H), f32),
                   jax.ShapeDtypeStruct((1, Bp, H), f32)),
        grid_spec=pltpu.PrefetchScalarGridSpec(
            num_scalar_prefetch=0,
            grid=(Bp // Bc, Tp // Tc),
            in_specs=[
                pl.BlockSpec((Tc, Bc, 3 * H), lambda b, t: (t, b, 0)),
                pl.BlockSpec((H, 3 * H), lambda b, t: (0, 0)),
                pl.BlockSpec((1, H), lambda b, t: (0, 0)),
            ],
            out_specs=[
                pl.BlockSpec((Tc, Bc, H), lambda b, t: (t, b, 0)),
                pl.BlockSpec((1, Bc, H), lambda b, t: (0, b, 0)),
            ],
            scratch_shapes=[pltpu.VMEM((Bc, H), f32)],
        ),
        compiler_params=pltpu.CompilerParams(
            dimension_semantics=("parallel", "arbitrary"),
            vmem_limit_bytes=_vmem_limit(blk),
        ),
    )(gx, w_hh_t, b_hh_n)

    # ---- Phase 3: vocab head for all Tp*Bp hidden states at once. ----
    logits_flat = _matmul_bias(h_all.reshape(Tp * Bp, H), w_fc_t, b_fc_p,
                               out_dtype=f32)
    # TODO(synk): fold this (T, B, V) -> (B, T, V) reorder into phase 3's
    # out_spec (or emit h_all batch-major from phase 2) to drop one full HBM
    # pass over the largest tensor; it needs an in-kernel leading-dims
    # relayout (pltpu.einshape) that is not validated on this toolchain.
    logits = jnp.transpose(logits_flat.reshape(Tp, Bp, Vp),
                           (1, 0, 2))[:B, :T, :n_vocab]
    return logits, h_last[:, :B, :]


# ---------------------------------------------------------------------------
# Pure-JAX reference replicating torch.nn.GRU (1 layer, batch_first) + Linear.
# ---------------------------------------------------------------------------
def _reference_forward(x, w_ih, w_hh, b_ih, b_hh, w_fc, b_fc):
    B, T, L = x.shape
    H = w_hh.shape[1]

    def step(h, x_t):
        gx = x_t @ w_ih.T + b_ih
        gh = h @ w_hh.T + b_hh
        r = jax.nn.sigmoid(gx[:, :H] + gh[:, :H])
        z = jax.nn.sigmoid(gx[:, H:2 * H] + gh[:, H:2 * H])
        n = jnp.tanh(gx[:, 2 * H:] + r * gh[:, 2 * H:])
        h_new = (1.0 - z) * n + z * h
        return h_new, h_new

    h0 = jnp.zeros((B, H), jnp.float32)
    x_tbl = jnp.transpose(x, (1, 0, 2))
    h_last, outs = lax.scan(step, h0, x_tbl)
    outs = jnp.transpose(outs, (1, 0, 2))                    # (B, T, H)
    logits = outs @ w_fc.T + b_fc
    return logits, h_last[None]


if __name__ == "__main__":
    # Small shapes consistent with the module (d_dim / n_vocab scaled down).
    B, T = 2, 8
    LATENT = 128     # module default latent_dim
    D_DIM = 128      # scaled-down d_dim (default 512); multiple of 128
    N_VOCAB = 200    # deliberately NOT a multiple of 128: exercises V padding

    key = jax.random.PRNGKey(0)
    kx, k1, k2, k3, k4, k5, k6 = jax.random.split(key, 7)

    x = jax.random.normal(kx, (B, T, LATENT), jnp.float32)

    # PyTorch-like uniform(-1/sqrt(H), 1/sqrt(H)) init.
    s = 1.0 / jnp.sqrt(D_DIM)
    w_ih = jax.random.uniform(k1, (3 * D_DIM, LATENT), jnp.float32, -s, s)
    w_hh = jax.random.uniform(k2, (3 * D_DIM, D_DIM), jnp.float32, -s, s)
    b_ih = jax.random.uniform(k3, (3 * D_DIM,), jnp.float32, -s, s)
    b_hh = jax.random.uniform(k4, (3 * D_DIM,), jnp.float32, -s, s)
    w_fc = jax.random.uniform(k5, (N_VOCAB, D_DIM), jnp.float32, -s, s)
    b_fc = jax.random.uniform(k6, (N_VOCAB,), jnp.float32, -s, s)

    # Weight transpose / pad / cast done once, outside the per-call path.
    params = prepare_vae_decoder_params(w_ih, w_hh, b_ih, b_hh, w_fc, b_fc)

    logits, hidden = vae_decoder_forward(x, params, n_vocab=N_VOCAB)
    jax.block_until_ready((logits, hidden))

    ref_logits, ref_hidden = _reference_forward(x, w_ih, w_hh, b_ih, b_hh,
                                                w_fc, b_fc)

    assert logits.shape == (B, T, N_VOCAB)
    assert hidden.shape == (1, B, D_DIM)
    assert jnp.allclose(logits, ref_logits, atol=5e-4, rtol=5e-4)
    assert jnp.allclose(hidden, ref_hidden, atol=5e-4, rtol=5e-4)

    print("KERNEL_OK")
</pallas_src>

<mosaic_0001>
module attributes {stable_mosaic.version = 11 : i64} {
  func.func @_matmul_bias_kernel(%arg0: i32, %arg1: i32, %arg2: memref<64x128xf32, #tpu.memory_space<vmem>>, %arg3: memref<128x384xf32, #tpu.memory_space<vmem>>, %arg4: memref<1x384xf32, #tpu.memory_space<vmem>>, %arg5: memref<64x384xf32, #tpu.memory_space<vmem>>) attributes {dimension_semantics = [#tpu.dimension_semantics<parallel>, #tpu.dimension_semantics<parallel>], iteration_bounds = array<i64: 1, 1>, scalar_prefetch = 0 : i64, scratch_operands = 0 : i64, tpu.core_type = #tpu.core_type<tc>, window_params = [{transform_indices = @transform_0, window_bounds = array<i64: 64, 128>}, {transform_indices = @transform_1, window_bounds = array<i64: 128, 384>}, {transform_indices = @transform_2, window_bounds = array<i64: 1, 384>}, {transform_indices = @transform_3, window_bounds = array<i64: 64, 384>}]} {
    %c0 = arith.constant 0 : index
    %c0_0 = arith.constant 0 : index
    %0 = vector.load %arg2[%c0, %c0_0] : memref<64x128xf32, #tpu.memory_space<vmem>>, vector<64x128xf32>
    %c0_1 = arith.constant 0 : index
    %c0_2 = arith.constant 0 : index
    %1 = vector.load %arg3[%c0_1, %c0_2] : memref<128x384xf32, #tpu.memory_space<vmem>>, vector<128x384xf32>
    %cst = arith.constant dense<0.000000e+00> : vector<64x384xf32>
    %2 = tpu.matmul %0, %1, %cst {dimension_numbers = #tpu.dot_dimension_numbers<[1], [0], [0], [1], [0, 0, 1, 1], [], []>} : vector<64x128xf32>, vector<128x384xf32>, vector<64x384xf32> -> vector<64x384xf32>
    %c0_3 = arith.constant 0 : index
    %c0_4 = arith.constant 0 : index
    %3 = vector.load %arg4[%c0_3, %c0_4] : memref<1x384xf32, #tpu.memory_space<vmem>>, vector<1x384xf32>
    %4 = vector.broadcast %3 : vector<1x384xf32> to vector<64x384xf32>
    %5 = arith.addf %2, %4 : vector<64x384xf32>
    %c0_5 = arith.constant 0 : index
    %c0_6 = arith.constant 0 : index
    %6 = vector.load %arg5[%c0_5, %c0_6] : memref<64x384xf32, #tpu.memory_space<vmem>>, vector<64x384xf32>
    tpu.vector_store %arg5[%c0_5, %c0_6], %5 {strides = array<i32>} : memref<64x384xf32, #tpu.memory_space<vmem>>, vector<64x384xf32>,
    return
  }
  func.func @transform_0(%arg0: i32, %arg1: i32) -> (i32, i32) {
    %c0_i32 = arith.constant 0 : i32
    %c0_i32_0 = arith.constant 0 : i32
    return %arg1, %c0_i32 : i32, i32
  }
  func.func @transform_1(%arg0: i32, %arg1: i32) -> (i32, i32) {
    %c0_i32 = arith.constant 0 : i32
    %c0_i32_0 = arith.constant 0 : i32
    return %c0_i32, %arg0 : i32, i32
  }
  func.func @transform_2(%arg0: i32, %arg1: i32) -> (i32, i32) {
    %c0_i32 = arith.constant 0 : i32
    %c0_i32_0 = arith.constant 0 : i32
    return %c0_i32, %arg0 : i32, i32
  }
  func.func @transform_3(%arg0: i32, %arg1: i32) -> (i32, i32) {
    %c0_i32 = arith.constant 0 : i32
    return %arg1, %arg0 : i32, i32
  }
}

module attributes {stable_mosaic.version = 11 : i64} {
  func.func @_gru_recurrent_kernel(%arg0: i32, %arg1: i32, %arg2: memref<8x8x384xf32, #tpu.memory_space<vmem>>, %arg3: memref<128x384xf32, #tpu.memory_space<vmem>>, %arg4: memref<1x128xf32, #tpu.memory_space<vmem>>, %arg5: memref<8x8x128xf32, #tpu.memory_space<vmem>>, %arg6: memref<1x8x128xf32, #tpu.memory_space<vmem>>, %arg7: memref<8x128xf32, #tpu.memory_space<vmem>>) attributes {dimension_semantics = [#tpu.dimension_semantics<parallel>, #tpu.dimension_semantics<arbitrary>], iteration_bounds = array<i64: 1, 1>, scalar_prefetch = 0 : i64, scratch_operands = 1 : i64, tpu.core_type = #tpu.core_type<tc>, window_params = [{transform_indices = @transform_0, window_bounds = array<i64: 8, 8, 384>}, {pipeline_mode = #tpu.pipeline_mode<synchronous>, transform_indices = @transform_1, window_bounds = array<i64: 128, 384>}, {pipeline_mode = #tpu.pipeline_mode<synchronous>, transform_indices = @transform_2, window_bounds = array<i64: 1, 128>}, {transform_indices = @transform_3, window_bounds = array<i64: 8, 8, 128>}, {transform_indices = @transform_4, window_bounds = array<i64: 1, 8, 128>}]} {
    %c0_i32 = arith.constant 0 : i32
    %0 = arith.cmpi eq, %arg1, %c0_i32 : i32
    %1 = arith.extui %0 : i1 to i32
    %c0_i32_0 = arith.constant 0 : i32
    %2 = arith.cmpi ne, %1, %c0_i32_0 : i32
    scf.if %2 {
      %cst = arith.constant 0.000000e+00 : f32
      %13 = vector.broadcast %cst : f32 to vector<8x128xf32>
      %c0_11 = arith.constant 0 : index
      %c0_12 = arith.constant 0 : index
      %14 = vector.load %arg7[%c0_11, %c0_12] : memref<8x128xf32, #tpu.memory_space<vmem>>, vector<8x128xf32>
      tpu.vector_store %arg7[%c0_11, %c0_12], %13 {strides = array<i32>} : memref<8x128xf32, #tpu.memory_space<vmem>>, vector<8x128xf32>,
    } else {
    }
    %c0 = arith.constant 0 : index
    %c0_1 = arith.constant 0 : index
    %3 = vector.load %arg4[%c0, %c0_1] : memref<1x128xf32, #tpu.memory_space<vmem>>, vector<1x128xf32>
    %4 = vector.shape_cast %3 : vector<1x128xf32> to vector<1x128xf32>
    %5 = vector.broadcast %4 : vector<1x128xf32> to vector<8x128xf32>
    %c0_2 = arith.constant 0 : index
    %c0_3 = arith.constant 0 : index
    %6 = vector.load %arg7[%c0_2, %c0_3] : memref<8x128xf32, #tpu.memory_space<vmem>>, vector<8x128xf32>
    %c0_i32_4 = arith.constant 0 : i32
    %c8_i32 = arith.constant 8 : i32
    %7 = arith.addi %c0_i32_4, %c8_i32 : i32
    %c1_i32 = arith.constant 1 : i32
    %8 = scf.for %arg8 = %c0_i32_4 to %7 step %c1_i32 iter_args(%arg9 = %6) -> (vector<8x128xf32>)  : i32 {
      %13 = arith.index_cast %arg8 : i32 to index
      %c0_11 = arith.constant 0 : index
      %c0_12 = arith.constant 0 : index
      %14 = vector.load %arg2[%13, %c0_11, %c0_12] : memref<8x8x384xf32, #tpu.memory_space<vmem>>, vector<1x8x384xf32>
      %15 = vector.shape_cast %14 : vector<1x8x384xf32> to vector<8x384xf32>
      %c0_13 = arith.constant 0 : index
      %c0_14 = arith.constant 0 : index
      %16 = vector.load %arg3[%c0_13, %c0_14] : memref<128x384xf32, #tpu.memory_space<vmem>>, vector<128x384xf32>
      %cst = arith.constant dense<0.000000e+00> : vector<8x384xf32>
      %17 = tpu.matmul %arg9, %16, %cst {dimension_numbers = #tpu.dot_dimension_numbers<[1], [0], [0], [1], [0, 0, 1, 1], [], []>} : vector<8x128xf32>, vector<128x384xf32>, vector<8x384xf32> -> vector<8x384xf32>
      %18 = vector.extract_strided_slice %15 {offsets = [0, 0], sizes = [8, 128], strides = [1, 1]} : vector<8x384xf32> to vector<8x128xf32>
      %19 = vector.extract_strided_slice %17 {offsets = [0, 0], sizes = [8, 128], strides = [1, 1]} : vector<8x384xf32> to vector<8x128xf32>
      %20 = arith.addf %18, %19 : vector<8x128xf32>
      %21 = arith.negf %20 : vector<8x128xf32>
      %22 = math.exp %21 : vector<8x128xf32>
      %cst_15 = arith.constant 1.000000e+00 : f32
      %23 = vector.broadcast %cst_15 : f32 to vector<8x128xf32>
      %24 = arith.addf %23, %22 : vector<8x128xf32>
      %25 = arith.divf %23, %24 : vector<8x128xf32>
      %26 = vector.extract_strided_slice %15 {offsets = [0, 128], sizes = [8, 128], strides = [1, 1]} : vector<8x384xf32> to vector<8x128xf32>
      %27 = vector.extract_strided_slice %17 {offsets = [0, 128], sizes = [8, 128], strides = [1, 1]} : vector<8x384xf32> to vector<8x128xf32>
      %28 = arith.addf %26, %27 : vector<8x128xf32>
      %29 = arith.negf %28 : vector<8x128xf32>
      %30 = math.exp %29 : vector<8x128xf32>
      %cst_16 = arith.constant 1.000000e+00 : f32
      %31 = vector.broadcast %cst_16 : f32 to vector<8x128xf32>
      %32 = arith.addf %31, %30 : vector<8x128xf32>
      %33 = arith.divf %31, %32 : vector<8x128xf32>
      %34 = vector.extract_strided_slice %15 {offsets = [0, 256], sizes = [8, 128], strides = [1, 1]} : vector<8x384xf32> to vector<8x128xf32>
      %35 = vector.extract_strided_slice %17 {offsets = [0, 256], sizes = [8, 128], strides = [1, 1]} : vector<8x384xf32> to vector<8x128xf32>
      %36 = arith.addf %35, %5 : vector<8x128xf32>
      %37 = arith.mulf %25, %36 : vector<8x128xf32>
      %38 = arith.addf %34, %37 : vector<8x128xf32>
      %39 = math.tanh %38 : vector<8x128xf32>
      %cst_17 = arith.constant 1.000000e+00 : f32
      %40 = vector.broadcast %cst_17 : f32 to vector<8x128xf32>
      %41 = arith.subf %40, %33 : vector<8x128xf32>
      %42 = arith.mulf %41, %39 : vector<8x128xf32>
      %43 = arith.mulf %33, %arg9 : vector<8x128xf32>
      %44 = arith.addf %42, %43 : vector<8x128xf32>
      %45 = arith.index_cast %arg8 : i32 to index
      %c0_18 = arith.constant 0 : index
      %c0_19 = arith.constant 0 : index
      %46 = vector.load %arg5[%45, %c0_18, %c0_19] : memref<8x8x128xf32, #tpu.memory_space<vmem>>, vector<1x8x128xf32>
      %47 = vector.shape_cast %46 : vector<1x8x128xf32> to vector<8x128xf32>
      %48 = vector.shape_cast %44 : vector<8x128xf32> to vector<1x8x128xf32>
      tpu.vector_store %arg5[%45, %c0_18, %c0_19], %48 {strides = array<i32>} : memref<8x8x128xf32, #tpu.memory_space<vmem>>, vector<1x8x128xf32>,
      scf.yield %44 : vector<8x128xf32>
    }
    %c8_i32_5 = arith.constant 8 : i32
    %c0_6 = arith.constant 0 : index
    %c0_7 = arith.constant 0 : index
    %9 = vector.load %arg7[%c0_6, %c0_7] : memref<8x128xf32, #tpu.memory_space<vmem>>, vector<8x128xf32>
    tpu.vector_store %arg7[%c0_6, %c0_7], %8 {strides = array<i32>} : memref<8x128xf32, #tpu.memory_space<vmem>>, vector<8x128xf32>,
    %c0_8 = arith.constant 0 : index
    %c0_9 = arith.constant 0 : index
    %c0_10 = arith.constant 0 : index
    %10 = vector.load %arg6[%c0_8, %c0_9, %c0_10] : memref<1x8x128xf32, #tpu.memory_space<vmem>>, vector<1x8x128xf32>
    %11 = vector.shape_cast %10 : vector<1x8x128xf32> to vector<8x128xf32>
    %12 = vector.shape_cast %8 : vector<8x128xf32> to vector<1x8x128xf32>
    tpu.vector_store %arg6[%c0_8, %c0_9, %c0_10], %12 {strides = array<i32>} : memref<1x8x128xf32, #tpu.memory_space<vmem>>, vector<1x8x128xf32>,
    return
  }
  func.func @transform_0(%arg0: i32, %arg1: i32) -> (i32, i32, i32) {
    %c0_i32 = arith.constant 0 : i32
    %c0_i32_0 = arith.constant 0 : i32
    return %arg1, %arg0, %c0_i32 : i32, i32, i32
  }
  func.func @transform_1(%arg0: i32, %arg1: i32) -> (i32, i32) {
    %c0_i32 = arith.constant 0 : i32
    %c0_i32_0 = arith.constant 0 : i32
    %c0_i32_1 = arith.constant 0 : i32
    return %c0_i32, %c0_i32_0 : i32, i32
  }
  func.func @transform_2(%arg0: i32, %arg1: i32) -> (i32, i32) {
    %c0_i32 = arith.constant 0 : i32
    %c0_i32_0 = arith.constant 0 : i32
    %c0_i32_1 = arith.constant 0 : i32
    return %c0_i32, %c0_i32_0 : i32, i32
  }
  func.func @transform_3(%arg0: i32, %arg1: i32) -> (i32, i32, i32) {
    %c0_i32 = arith.constant 0 : i32
    %c0_i32_0 = arith.constant 0 : i32
    return %arg1, %arg0, %c0_i32 : i32, i32, i32
  }
  func.func @transform_4(%arg0: i32, %arg1: i32) -> (i32, i32, i32) {
    %c0_i32 = arith.constant 0 : i32
    %c0_i32_0 = arith.constant 0 : i32
    %c0_i32_1 = arith.constant 0 : i32
    return %c0_i32, %arg0, %c0_i32_0 : i32, i32, i32
  }
}

module attributes {stable_mosaic.version = 11 : i64} {
  func.func @_matmul_bias_kernel(%arg0: i32, %arg1: i32, %arg2: memref<64x128xf32, #tpu.memory_space<vmem>>, %arg3: memref<128x256xf32, #tpu.memory_space<vmem>>, %arg4: memref<1x256xf32, #tpu.memory_space<vmem>>, %arg5: memref<64x256xf32, #tpu.memory_space<vmem>>) attributes {dimension_semantics = [#tpu.dimension_semantics<parallel>, #tpu.dimension_semantics<parallel>], iteration_bounds = array<i64: 1, 1>, scalar_prefetch = 0 : i64, scratch_operands = 0 : i64, tpu.core_type = #tpu.core_type<tc>, window_params = [{transform_indices = @transform_0, window_bounds = array<i64: 64, 128>}, {transform_indices = @transform_1, window_bounds = array<i64: 128, 256>}, {transform_indices = @transform_2, window_bounds = array<i64: 1, 256>}, {transform_indices = @transform_3, window_bounds = array<i64: 64, 256>}]} {
    %c0 = arith.constant 0 : index
    %c0_0 = arith.constant 0 : index
    %0 = vector.load %arg2[%c0, %c0_0] : memref<64x128xf32, #tpu.memory_space<vmem>>, vector<64x128xf32>
    %c0_1 = arith.constant 0 : index
    %c0_2 = arith.constant 0 : index
    %1 = vector.load %arg3[%c0_1, %c0_2] : memref<128x256xf32, #tpu.memory_space<vmem>>, vector<128x256xf32>
    %cst = arith.constant dense<0.000000e+00> : vector<64x256xf32>
    %2 = tpu.matmul %0, %1, %cst {dimension_numbers = #tpu.dot_dimension_numbers<[1], [0], [0], [1], [0, 0, 1, 1], [], []>} : vector<64x128xf32>, vector<128x256xf32>, vector<64x256xf32> -> vector<64x256xf32>
    %c0_3 = arith.constant 0 : index
    %c0_4 = arith.constant 0 : index
    %3 = vector.load %arg4[%c0_3, %c0_4] : memref<1x256xf32, #tpu.memory_space<vmem>>, vector<1x256xf32>
    %4 = vector.broadcast %3 : vector<1x256xf32> to vector<64x256xf32>
    %5 = arith.addf %2, %4 : vector<64x256xf32>
    %c0_5 = arith.constant 0 : index
    %c0_6 = arith.constant 0 : index
    %6 = vector.load %arg5[%c0_5, %c0_6] : memref<64x256xf32, #tpu.memory_space<vmem>>, vector<64x256xf32>
    tpu.vector_store %arg5[%c0_5, %c0_6], %5 {strides = array<i32>} : memref<64x256xf32, #tpu.memory_space<vmem>>, vector<64x256xf32>,
    return
  }
  func.func @transform_0(%arg0: i32, %arg1: i32) -> (i32, i32) {
    %c0_i32 = arith.constant 0 : i32
    %c0_i32_0 = arith.constant 0 : i32
    return %arg1, %c0_i32 : i32, i32
  }
  func.func @transform_1(%arg0: i32, %arg1: i32) -> (i32, i32) {
    %c0_i32 = arith.constant 0 : i32
    %c0_i32_0 = arith.constant 0 : i32
    return %c0_i32, %arg0 : i32, i32
  }
  func.func @transform_2(%arg0: i32, %arg1: i32) -> (i32, i32) {
    %c0_i32 = arith.constant 0 : i32
    %c0_i32_0 = arith.constant 0 : i32
    return %c0_i32, %arg0 : i32, i32
  }
  func.func @transform_3(%arg0: i32, %arg1: i32) -> (i32, i32) {
    %c0_i32 = arith.constant 0 : i32
    return %arg1, %arg0 : i32, i32
  }
}

</mosaic_0001>

<bundles_post_ra>
// kernel: vae_decoder_forward.4
= control target key start
LH: loop header
LB: loop body
LE: loop exit
PB: predicated region body
PF: predicated region fallthrough
CT: control target
= control target key end

     0   :  { %10 = vsyncpa [#allocation4], 0  ;;  %s315_s18 = smov [#allocation3]   ;;  %s316_s20 = smov 384   ;;  %s387_s0 = inlined_call_operand.vmem [shape: f32[8,8,384], index: 0, kind: input, shape index: {}]   ;;  %s388_s1 = inlined_call_operand.hbm [shape: f32[128,384], index: 1, kind: input, shape index: {}]   ;;  %s389_s2 = inlined_call_operand.vmem [shape: f32[1,128], index: 2, kind: input, shape index: {}]   ;;  %s390_s3 = inlined_call_operand.vmem [shape: f32[8,8,128], index: 3, kind: output, shape index: {0}]   ;;  %s391_s4 = inlined_call_operand.vmem [shape: f32[1,8,128], index: 4, kind: output, shape index: {1}]  }
   0x1   :  { %s17_s17 = sshll.u32 %s388_s1, 4  ;;  %s19_s19 = sshll.u32 %s315_s18, 4  ;;  %s18_s17 = int_to_ptr.hbm [resolvable:$true] %s17_s17  ;;  %s20_s19 = int_to_ptr.vmem [resolvable:$true] %s19_s19 }
   0x2   :  { %s317_s21 = smov 24  }
   0x3   :  { %25 = dma.hbm_to_vmem [thread:$0]  %s18_s17, 6144, %s20_s19, [#allocation4], %s316_s20, %s316_s20, %s317_s21  }
   0x4   :  { %305 = dma.done.wait [#allocation4], 6144  }
   0x5   :  { %306 = vsyncadd [#allocation4], 4294961152  ;;  %v349_v0 = vld [vmem:[%s389_s2] ss:$0 sm:$0xff]  ;;  %v351_v1 = vmov 0.0   ;;  %s353_s24 = smov 0  }
   0x6 LB: > { %v100_v2 = vld [vmem:[#allocation3 + $0x168] sm:$0xff]  ;;  %v101_v3 = vld [vmem:[#allocation3 + $0x170] sm:$0xff]  ;;  %v98_v5 = vld [vmem:[#allocation3 + $0x158] sm:$0xff]  ;;  %s241_s1 = smul.u32 24, %s313_s24  ;;  %s240_s27 = sshll.u32 %s313_s24, 3  ;;  %s313_s24 = sphi %s353_s24, %s47_s24   ;;  %v309_v1 = vphi %v351_v1, %v392_v1  }
   0x7   : > { %v97_v4 = vld [vmem:[#allocation3 + $0x150] sm:$0xff]  ;;  %103 = vmatpush.msra.mxu0 %v100_v2  ;;  %123 = vmatpush.msra.mxu1 %v101_v3  ;;  %v94_v6 = vld [vmem:[#allocation3 + $0x138] sm:$0xff]  ;;  %v95_v7 = vld [vmem:[#allocation3 + $0x140] sm:$0xff]  ;;  %s212_s30 = scalar_lea.vmem %s390_s3, %s240_s27  ;;  %s47_s24 = sadd.s32 1, %s313_s24  }
   0x8   : > { %v91_v8 = vld [vmem:[#allocation3 + $0x120] sm:$0xff]  ;;  %v92_v9 = vld [vmem:[#allocation3 + $0x128] sm:$0xff]  ;;  %v89_v11 = vld [vmem:[#allocation3 + $0x110] sm:$0xff]  ;;  %s368_s26 = scalar_lea.vmem %s387_s0, %s241_s1  ;;  %p44_p0 = scmp.ge.s32.totalorder %s47_s24, 8  }
   0x9   : > { %104 = vmatpush.msra.mxu0 %v97_v4  ;;  %124 = vmatpush.msra.mxu1 %v98_v5  ;;  %v88_v10 = vld [vmem:[#allocation3 + $0x108] sm:$0xff]  ;;  %v85_v12 = vld [vmem:[#allocation3 + $0xf0] sm:$0xff]  ;;  %v86_v13 = vld [vmem:[#allocation3 + $0xf8] sm:$0xff] }
   0xa   : > { %v102_v14 = vld [vmem:[#allocation3 + $0x178] sm:$0xff]  ;;  %v99_v15 = vld [vmem:[#allocation3 + $0x160] sm:$0xff]  ;;  %v96_v18 = vld [vmem:[#allocation3 + $0x148] sm:$0xff] }
   0xb   : > { %105 = vmatpush.msra.mxu0 %v94_v6  ;;  %125 = vmatpush.msra.mxu1 %v95_v7  ;;  %v82_v16 = vld [vmem:[#allocation3 + $0xd8] sm:$0xff]  ;;  %v83_v17 = vld [vmem:[#allocation3 + $0xe0] sm:$0xff]  ;;  %v80_v20 = vld [vmem:[#allocation3 + $0xc8] sm:$0xff] }
   0xc   : > { %143 = vmatpush.msra.mxu2 %v102_v14  ;;  %v79_v19 = vld [vmem:[#allocation3 + $0xc0] sm:$0xff]  ;;  %v93_v21 = vld [vmem:[#allocation3 + $0x130] sm:$0xff]  ;;  %v76_v22 = vld [vmem:[#allocation3 + $0xa8] sm:$0xff] }
   0xd   : > { %106 = vmatpush.msra.mxu0 %v91_v8  ;;  %126 = vmatpush.msra.mxu1 %v92_v9  ;;  %v77_v23 = vld [vmem:[#allocation3 + $0xb0] sm:$0xff]  ;;  %v90_v24 = vld [vmem:[#allocation3 + $0x118] sm:$0xff]  ;;  %v87_v27 = vld [vmem:[#allocation3 + $0x100] sm:$0xff] }
   0xe   : > { %144 = vmatpush.msra.mxu2 %v99_v15  ;;  %v73_v25 = vld [vmem:[#allocation3 + $0x90] sm:$0xff]  ;;  %v74_v26 = vld [vmem:[#allocation3 + $0x98] sm:$0xff]  ;;  %v71_v29 = vld [vmem:[#allocation3 + $0x80] sm:$0xff] }
   0xf   : > { %107 = vmatpush.msra.mxu0 %v88_v10  ;;  %127 = vmatpush.msra.mxu1 %v89_v11  ;;  %v70_v28 = vld [vmem:[#allocation3 + $0x78] sm:$0xff]  ;;  %v84_v30 = vld [vmem:[#allocation3 + $0xe8] sm:$0xff]  ;;  %v67_v31 = vld [vmem:[#allocation3 + $0x60] sm:$0xff] }
  0x10   : > { %145 = vmatpush.msra.mxu2 %v96_v18  ;;  %v68_v32 = vld [vmem:[#allocation3 + $0x68] sm:$0xff]  ;;  %v81_v33 = vld [vmem:[#allocation3 + $0xd0] sm:$0xff]  ;;  %v78_v36 = vld [vmem:[#allocation3 + $0xb8] sm:$0xff] }
  0x11   : > { %108 = vmatpush.msra.mxu0 %v85_v12  ;;  %128 = vmatpush.msra.mxu1 %v86_v13  ;;  %v64_v34 = vld [vmem:[#allocation3 + $0x48] sm:$0xff]  ;;  %v65_v35 = vld [vmem:[#allocation3 + $0x50] sm:$0xff]  ;;  %v62_v38 = vld [vmem:[#allocation3 + $0x38] sm:$0xff] }
  0x12   : > { %146 = vmatpush.msra.mxu2 %v93_v21  ;;  %v61_v37 = vld [vmem:[#allocation3 + $0x30] sm:$0xff]  ;;  %v75_v39 = vld [vmem:[#allocation3 + $0xa0] sm:$0xff]  ;;  %v58_v40 = vld [vmem:[#allocation3 + $0x18] sm:$0xff] }
  0x13   : > { %109 = vmatpush.msra.mxu0 %v82_v16  ;;  %129 = vmatpush.msra.mxu1 %v83_v17  ;;  %v59_v41 = vld [vmem:[#allocation3 + $0x20] sm:$0xff]  ;;  %v72_v42 = vld [vmem:[#allocation3 + $0x88] sm:$0xff]  ;;  %v69_v45 = vld [vmem:[#allocation3 + $0x70] sm:$0xff] }
  0x14   : > { %147 = vmatpush.msra.mxu2 %v90_v24  ;;  %v55_v43 = vld [vmem:[#allocation3] sm:$0xff]  ;;  %v56_v44 = vld [vmem:[#allocation3 + $0x8] sm:$0xff]  ;;  %v66_v46 = vld [vmem:[#allocation3 + $0x58] sm:$0xff] }
  0x15   : > { %110 = vmatpush.msra.mxu0 %v79_v19  ;;  %130 = vmatpush.msra.mxu1 %v80_v20  ;;  %v63_v47 = vld [vmem:[#allocation3 + $0x40] sm:$0xff]  ;;  %v60_v48 = vld [vmem:[#allocation3 + $0x28] sm:$0xff]  ;;  %v57_v49 = vld [vmem:[#allocation3 + $0x10] sm:$0xff] }
  0x16   : > { %148 = vmatpush.msra.mxu2 %v87_v27  ;;  %v52_v50 = vld [vmem:[%s368_s26] sm:$0xff]  ;;  %v53_v51 = vld [vmem:[%s368_s26 + $0x8] sm:$0xff]  ;;  %v54_v16 = vld [vmem:[%s368_s26 + $0x10] sm:$0xff] }
  0x17   : > { %111 = vmatpush.msra.mxu0 %v76_v22  ;;  %131 = vmatpush.msra.mxu1 %v77_v23 }
  0x18   : > { %149 = vmatpush.msra.mxu2 %v84_v30 }
  0x19   : > { %112 = vmatpush.msra.mxu0 %v73_v25  ;;  %132 = vmatpush.msra.mxu1 %v74_v26 }
  0x1a   : > { %150 = vmatpush.msra.mxu2 %v81_v33 }
  0x1b   : > { %113 = vmatpush.msra.mxu0 %v70_v28  ;;  %133 = vmatpush.msra.mxu1 %v71_v29 }
  0x1c   : > { %151 = vmatpush.msra.mxu2 %v78_v36 }
  0x1d   : > { %114 = vmatpush.msra.mxu0 %v67_v31  ;;  %134 = vmatpush.msra.mxu1 %v68_v32 }
  0x1e   : > { %152 = vmatpush.msra.mxu2 %v75_v39 }
  0x1f   : > { %115 = vmatpush.msra.mxu0 %v64_v34  ;;  %135 = vmatpush.msra.mxu1 %v65_v35 }
  0x20   : > { %153 = vmatpush.msra.mxu2 %v72_v42 }
  0x21   : > { %116 = vmatpush.msra.mxu0 %v61_v37  ;;  %136 = vmatpush.msra.mxu1 %v62_v38 }
  0x22   : > { %154 = vmatpush.msra.mxu2 %v69_v45 }
  0x23   : > { %117 = vmatpush.msra.mxu0 %v58_v40  ;;  %137 = vmatpush.msra.mxu1 %v59_v41 }
  0x24   : > { %155 = vmatpush.msra.mxu2 %v66_v46 }
  0x25   : > { %118 = vmatpush.msra.mxu0 %v55_v43  ;;  %138 = vmatpush.msra.mxu1 %v56_v44 }
  0x26   : > { %119 = vmatmul.f32.vlgmr.msra.gmra.mxu0 %v309_v1  ;;  %139 = vmatmul.f32.vlgmr.msra.gmra.mxu1 %v309_v1 }
  0x27   : > { %156 = vmatpush.msra.mxu2 %v63_v47 }
  0x29   : > { %157 = vmatpush.msra.mxu2 %v60_v48 }
  0x2b   : > { %158 = vmatpush.msra.mxu2 %v57_v49 }
  0x2c   : > { %159 = vmatmul.f32.vlgmr.msra.gmra.mxu2 %v309_v1 }
  0xa3   : > { %v120_v52 = vpop.f32.mrf.mxu0  ;;  %v140_v53 = vpop.f32.mrf.mxu1 }
  0xa4   : > { %v163_v54 = vadd.f32 %v120_v52, %v52_v50  ;;  %v183_v55 = vadd.f32 %v140_v53, %v53_v51 }
  0xa6   : > { %v238_v56 = vmul.f32 -1.442695, %v163_v54  ;;  %v239_v57 = vmul.f32 -1.442695, %v183_v55 }
  0xa8   : > { %263 = vpow2.f32 %v238_v56 }
  0xa9   : > { %265 = vpow2.f32 %v239_v57 }
  0xae   : > { %v264_v58 = vpop.eup %263 }
  0xaf   : > { %v266_v59 = vpop.eup %265  ;;  %v167_v60 = vadd.f32 1.0, %v264_v58  ;;  %v160_v6 = vpop.f32.mrf.mxu2 }
  0xb0   : > { %v187_v61 = vadd.f32 1.0, %v266_v59  ;;  %v203_v12 = vadd.f32 %v349_v0, %v160_v6 }
  0xb1   : > { %267 = vrcp.f32 %v167_v60  ;;  %v179_v7 = vand.u32 2147483648, %v167_v60  ;;  %v177_v9 = vand.u32 2147483647, %v167_v60  ;;  %vm173_vm1 = vweird.f32 %v167_v60 }
  0xb2   : > { %269 = vrcp.f32 %v187_v61  ;;  %vm193_vm4 = vweird.f32 %v187_v61  ;;  %v199_v18 = vand.u32 2147483648, %v187_v61  ;;  %v197_v20 = vand.u32 2147483647, %v187_v61 }
  0xb3   : > { %v180_v13 = vor.u32 1.1754944e-38, %v179_v7  ;;  %vm178_vm3 = vcmp.eq.f32.partialorder %v177_v9, 8.507059e+37 }
  0xb4   : > { %v200_v23 = vor.u32 1.1754944e-38, %v199_v18  ;;  %vm198_vm7 = vcmp.eq.f32.partialorder %v197_v20, 8.507059e+37 }
  0xb7   : > { %v268_v62 = vpop.eup %267 }
  0xb8   : > { %v270_v63 = vpop.eup %269  ;;  %v169_v2 = vmul.f32 %v268_v62, %v167_v60  ;;  %vm174_vm0 = vweird.f32 %v268_v62 }
  0xb9   : > { %v189_v3 = vmul.f32 %v270_v63, %v187_v61  ;;  %vm175_vm2 = vmor %vm173_vm1, %vm174_vm0  ;;  %vm194_vm5 = vweird.f32 %v270_v63 }
  0xba   : > { %v170_v4 = vsub.f32 1.0, %v169_v2  ;;  %vm195_vm6 = vmor %vm193_vm4, %vm194_vm5 }
  0xbb   : > { %v190_v5 = vsub.f32 1.0, %v189_v3 }
  0xbc   : > { %v171_v8 = vmul.f32 %v268_v62, %v170_v4 }
  0xbd   : > { %v191_v10 = vmul.f32 %v270_v63, %v190_v5 }
  0xbe   : > { %v172_v11 = vadd.f32 %v268_v62, %v171_v8 }
  0xbf   : > { %v192_v15 = vadd.f32 %v270_v63, %v191_v10 }
  0xc0   : > { %v176_v14 = vsel %vm175_vm2, %v268_v62, %v172_v11 }
  0xc1   : > { %v181_v17 = vsel %vm178_vm3, %v180_v13, %v176_v14  ;;  %v196_v22 = vsel %vm195_vm6, %v270_v63, %v192_v15 }
  0xc2   : > { %v204_v19 = vmul.f32 %v203_v12, %v181_v17  ;;  %v201_v24 = vsel %vm198_vm7, %v200_v23, %v196_v22 }
  0xc3   : > { %v207_v25 = vsub.f32 1.0, %v201_v24  ;;  %v209_v28 = vmul.f32 %v309_v1, %v201_v24 }
  0xc4   : > { %v205_v21 = vadd.f32 %v204_v19, %v54_v16 }
  0xc6   : > { %271 = vtanh.f32 %v205_v21 }
  0xcc   : > { %v272_v26 = vpop.eup %271 }
  0xcd   : > { %v208_v27 = vmul.f32 %v272_v26, %v207_v25  ;;  %46 = sbr.rel (!%p44_p0) target bundleno = 6 (0x6), region = 57 }
  0xcf   : > { %v210_v29 = vadd.f32 %v209_v28, %v208_v27  }
  0xd1   : > { %213 = vst [vmem:[%s212_s30] sm:$0xff] %v210_v29  ;;  %v392_v1 = vmov %v210_v29 }
  0xd2   :  { %215 = vst [vmem:[%s391_s4] sm:$0xff] %v210_v29 }
  0xd3   :  { %224 = vsyncpa [#allocation4], 1 }

// kernel: vae_decoder_forward.3
= control target key start
LH: loop header
LB: loop body
LE: loop exit
PB: predicated region body
PF: predicated region fallthrough
CT: control target
= control target key end

     0   :  { %8 = vsyncpa [#allocation3], 0  ;;  %s307_s15 = smov [#allocation2]   ;;  %s308_s17 = smov 384   ;;  %s504_s0 = inlined_call_operand.vmem [shape: f32[64,128], index: 0, kind: input, shape index: {}]   ;;  %s505_s1 = inlined_call_operand.hbm [shape: f32[128,384], index: 1, kind: input, shape index: {}]   ;;  %s506_s2 = inlined_call_operand.vmem [shape: f32[1,384], index: 2, kind: input, shape index: {}]   ;;  %s507_s3 = inlined_call_operand.vmem [shape: f32[64,384], index: 3, kind: output, shape index: {}]  }
   0x1   :  { %s15_s14 = sshll.u32 %s505_s1, 4  ;;  %s17_s16 = sshll.u32 %s307_s15, 4  ;;  %s16_s14 = int_to_ptr.hbm [resolvable:$true] %s15_s14  ;;  %s18_s16 = int_to_ptr.vmem [resolvable:$true] %s17_s16 }
   0x2   :  { %s309_s18 = smov 24  }
   0x3   :  { %23 = dma.hbm_to_vmem [thread:$0]  %s16_s14, 6144, %s18_s16, [#allocation3], %s308_s17, %s308_s17, %s309_s18  }
   0x4   :  { %305 = dma.done.wait [#allocation3], 6144  }
   0x5   :  { %306 = vsyncadd [#allocation3], 4294961152  ;;  %v85_v0 = vld [vmem:[#allocation2 + $0x178] sm:$0xff]  ;;  %v82_v1 = vld [vmem:[#allocation2 + $0x160] sm:$0xff] }
   0x6   :  { %176 = vmatpush.msra.mxu2 %v85_v0  ;;  %v79_v2 = vld [vmem:[#allocation2 + $0x148] sm:$0xff]  ;;  %v333_v3 = vld [vmem:[#allocation2 + $0x170] sm:$0xff]  ;;  %v336_v4 = vld [vmem:[#allocation2 + $0x158] sm:$0xff] }
   0x7   :  { %135 = vmatpush.msra.mxu1 %v333_v3  ;;  %v76_v5 = vld [vmem:[#allocation2 + $0x130] sm:$0xff]  ;;  %v338_v6 = vld [vmem:[#allocation2 + $0x140] sm:$0xff]  ;;  %v83_v7 = vld [vmem:[#allocation2 + $0x168] sm:$0xff] }
   0x8   :  { %177 = vmatpush.msra.mxu2 %v82_v1  ;;  %v73_v8 = vld [vmem:[#allocation2 + $0x118] sm:$0xff]  ;;  %v341_v9 = vld [vmem:[#allocation2 + $0x128] sm:$0xff]  ;;  %94 = vmatpush.msra.mxu0 %v83_v7  ;;  %v80_v10 = vld [vmem:[#allocation2 + $0x150] sm:$0xff] }
   0x9   :  { %136 = vmatpush.msra.mxu1 %v336_v4  ;;  %246 = vmatpush.msra.mxu3 %v83_v7  ;;  %v77_v11 = vld [vmem:[#allocation2 + $0x138] sm:$0xff]  ;;  %v70_v12 = vld [vmem:[#allocation2 + $0x100] sm:$0xff]  ;;  %v344_v13 = vld [vmem:[#allocation2 + $0x110] sm:$0xff] }
   0xa   :  { %178 = vmatpush.msra.mxu2 %v79_v2  ;;  %95 = vmatpush.msra.mxu0 %v80_v10  ;;  %v74_v14 = vld [vmem:[#allocation2 + $0x120] sm:$0xff]  ;;  %v67_v15 = vld [vmem:[#allocation2 + $0xe8] sm:$0xff]  ;;  %v347_v16 = vld [vmem:[#allocation2 + $0xf8] sm:$0xff] }
   0xb   :  { %137 = vmatpush.msra.mxu1 %v338_v6  ;;  %247 = vmatpush.msra.mxu3 %v80_v10  ;;  %v71_v17 = vld [vmem:[#allocation2 + $0x108] sm:$0xff]  ;;  %v64_v18 = vld [vmem:[#allocation2 + $0xd0] sm:$0xff]  ;;  %v350_v19 = vld [vmem:[#allocation2 + $0xe0] sm:$0xff] }
   0xc   :  { %179 = vmatpush.msra.mxu2 %v76_v5  ;;  %96 = vmatpush.msra.mxu0 %v77_v11  ;;  %v68_v20 = vld [vmem:[#allocation2 + $0xf0] sm:$0xff]  ;;  %v61_v21 = vld [vmem:[#allocation2 + $0xb8] sm:$0xff]  ;;  %v353_v22 = vld [vmem:[#allocation2 + $0xc8] sm:$0xff] }
   0xd   :  { %138 = vmatpush.msra.mxu1 %v341_v9  ;;  %248 = vmatpush.msra.mxu3 %v77_v11  ;;  %v65_v23 = vld [vmem:[#allocation2 + $0xd8] sm:$0xff]  ;;  %v58_v24 = vld [vmem:[#allocation2 + $0xa0] sm:$0xff]  ;;  %v356_v25 = vld [vmem:[#allocation2 + $0xb0] sm:$0xff] }
   0xe   :  { %180 = vmatpush.msra.mxu2 %v73_v8  ;;  %97 = vmatpush.msra.mxu0 %v74_v14  ;;  %v62_v26 = vld [vmem:[#allocation2 + $0xc0] sm:$0xff]  ;;  %v55_v27 = vld [vmem:[#allocation2 + $0x88] sm:$0xff]  ;;  %v359_v28 = vld [vmem:[#allocation2 + $0x98] sm:$0xff] }
   0xf   :  { %139 = vmatpush.msra.mxu1 %v344_v13  ;;  %249 = vmatpush.msra.mxu3 %v74_v14  ;;  %v59_v29 = vld [vmem:[#allocation2 + $0xa8] sm:$0xff]  ;;  %v52_v30 = vld [vmem:[#allocation2 + $0x70] sm:$0xff]  ;;  %v362_v31 = vld [vmem:[#allocation2 + $0x80] sm:$0xff] }
  0x10   :  { %181 = vmatpush.msra.mxu2 %v70_v12  ;;  %98 = vmatpush.msra.mxu0 %v71_v17  ;;  %v56_v32 = vld [vmem:[#allocation2 + $0x90] sm:$0xff]  ;;  %v49_v33 = vld [vmem:[#allocation2 + $0x58] sm:$0xff]  ;;  %v365_v34 = vld [vmem:[#allocation2 + $0x68] sm:$0xff] }
  0x11   :  { %140 = vmatpush.msra.mxu1 %v347_v16  ;;  %250 = vmatpush.msra.mxu3 %v71_v17  ;;  %v53_v35 = vld [vmem:[#allocation2 + $0x78] sm:$0xff]  ;;  %v46_v36 = vld [vmem:[#allocation2 + $0x40] sm:$0xff]  ;;  %v368_v37 = vld [vmem:[#allocation2 + $0x50] sm:$0xff] }
  0x12   :  { %182 = vmatpush.msra.mxu2 %v67_v15  ;;  %99 = vmatpush.msra.mxu0 %v68_v20  ;;  %v50_v38 = vld [vmem:[#allocation2 + $0x60] sm:$0xff]  ;;  %v43_v39 = vld [vmem:[#allocation2 + $0x28] sm:$0xff]  ;;  %v45_v40 = vld [vmem:[#allocation2 + $0x38] sm:$0xff] }
  0x13   :  { %141 = vmatpush.msra.mxu1 %v350_v19  ;;  %251 = vmatpush.msra.mxu3 %v68_v20  ;;  %v47_v41 = vld [vmem:[#allocation2 + $0x48] sm:$0xff]  ;;  %v40_v42 = vld [vmem:[#allocation2 + $0x10] sm:$0xff]  ;;  %v42_v43 = vld [vmem:[#allocation2 + $0x20] sm:$0xff] }
  0x14   :  { %183 = vmatpush.msra.mxu2 %v64_v18  ;;  %100 = vmatpush.msra.mxu0 %v65_v23  ;;  %v30_v44 = vld [vmem:[%s504_s0] sm:$0xff]  ;;  %v44_v45 = vld [vmem:[#allocation2 + $0x30] sm:$0xff]  ;;  %v39_v46 = vld [vmem:[#allocation2 + $0x8] sm:$0xff] }
  0x15   :  { %142 = vmatpush.msra.mxu1 %v353_v22  ;;  %252 = vmatpush.msra.mxu3 %v65_v23  ;;  %v41_v47 = vld [vmem:[#allocation2 + $0x18] sm:$0xff]  ;;  %v38_v48 = vld [vmem:[#allocation2] sm:$0xff]  ;;  %v36_v49 = vld [vmem:[%s504_s0 + $0x30] sm:$0xff] }
  0x16   :  { %184 = vmatpush.msra.mxu2 %v61_v21  ;;  %101 = vmatpush.msra.mxu0 %v62_v26  ;;  %v31_v50 = vld [vmem:[%s504_s0 + $0x8] sm:$0xff]  ;;  %v37_v51 = vld [vmem:[%s504_s0 + $0x38] sm:$0xff]  ;;  %v32_v52 = vld [vmem:[%s504_s0 + $0x10] sm:$0xff] }
  0x17   :  { %143 = vmatpush.msra.mxu1 %v356_v25  ;;  %253 = vmatpush.msra.mxu3 %v62_v26  ;;  %v33_v53 = vld [vmem:[%s504_s0 + $0x18] sm:$0xff]  ;;  %v34_v54 = vld [vmem:[%s504_s0 + $0x20] sm:$0xff]  ;;  %v35_v55 = vld [vmem:[%s504_s0 + $0x28] sm:$0xff] }
  0x18   :  { %185 = vmatpush.msra.mxu2 %v58_v24  ;;  %102 = vmatpush.msra.mxu0 %v59_v29  ;;  %v86_v56 = vld [vmem:[%s506_s2] sm:$0x7] }
  0x19   :  { %144 = vmatpush.msra.mxu1 %v359_v28  ;;  %254 = vmatpush.msra.mxu3 %v59_v29  ;;  %v412_v57 = vperm.slane %v86_v56, 1  ;;  %v88_v59 = vperm.slane %v86_v56, 0  ;;  %v414_v60 = vperm.slane %v86_v56, 2 }
  0x1a   :  { %186 = vmatpush.msra.mxu2 %v55_v27  ;;  %103 = vmatpush.msra.mxu0 %v56_v32 }
  0x1b   :  { %145 = vmatpush.msra.mxu1 %v362_v31  ;;  %255 = vmatpush.msra.mxu3 %v56_v32 }
  0x1c   :  { %187 = vmatpush.msra.mxu2 %v52_v30  ;;  %104 = vmatpush.msra.mxu0 %v53_v35 }
  0x1d   :  { %146 = vmatpush.msra.mxu1 %v365_v34  ;;  %256 = vmatpush.msra.mxu3 %v53_v35 }
  0x1e   :  { %188 = vmatpush.msra.mxu2 %v49_v33  ;;  %105 = vmatpush.msra.mxu0 %v50_v38 }
  0x1f   :  { %147 = vmatpush.msra.mxu1 %v368_v37  ;;  %257 = vmatpush.msra.mxu3 %v50_v38 }
  0x20   :  { %189 = vmatpush.msra.mxu2 %v46_v36  ;;  %106 = vmatpush.msra.mxu0 %v47_v41 }
  0x21   :  { %148 = vmatpush.msra.mxu1 %v45_v40  ;;  %258 = vmatpush.msra.mxu3 %v47_v41 }
  0x22   :  { %190 = vmatpush.msra.mxu2 %v43_v39  ;;  %107 = vmatpush.msra.mxu0 %v44_v45 }
  0x23   :  { %149 = vmatpush.msra.mxu1 %v42_v43  ;;  %259 = vmatpush.msra.mxu3 %v44_v45 }
  0x24   :  { %191 = vmatpush.msra.mxu2 %v40_v42  ;;  %108 = vmatpush.msra.mxu0 %v41_v47 }
  0x25   :  { %192 = vmatmul.f32.vlgmr.msra.gmra.mxu2 %v30_v44  ;;  %150 = vmatpush.msra.mxu1 %v39_v46 }
  0x26   :  { %151 = vmatmul.f32.vlgmr.msra.gmra.mxu1 %v30_v44  ;;  %260 = vmatpush.msra.mxu3 %v41_v47 }
  0x27   :  { %109 = vmatpush.msra.mxu0 %v38_v48 }
  0x28   :  { %110 = vmatmul.f32.vlgmr.msra.gmra.mxu0 %v30_v44  ;;  %261 = vmatpush.msra.mxu3 %v38_v48 }
  0x29   :  { %128 = vmatmul.f32.vlgmr.msra.gmra.mxu3 %v36_v49 }
  0x2a   :  { %262 = vmatpush.msrb.mxu3 %v333_v3 }
  0x2c   :  { %263 = vmatpush.msrb.mxu3 %v336_v4 }
  0x2d   :  { %195 = vmatmul.f32.gmra.mxu2 %v31_v50 }
  0x2e   :  { %154 = vmatmul.f32.gmra.mxu1 %v31_v50  ;;  %264 = vmatpush.msrb.mxu3 %v338_v6 }
  0x30   :  { %265 = vmatpush.msrb.mxu3 %v341_v9  ;;  %113 = vmatmul.f32.gmra.mxu0 %v31_v50 }
  0x31   :  { %131 = vmatmul.f32.gmra.mxu3 %v37_v51 }
  0x32   :  { %266 = vmatpush.msrb.mxu3 %v344_v13 }
  0x34   :  { %267 = vmatpush.msrb.mxu3 %v347_v16 }
  0x35   :  { %198 = vmatmul.f32.gmra.mxu2 %v32_v52 }
  0x36   :  { %157 = vmatmul.f32.gmra.mxu1 %v32_v52  ;;  %268 = vmatpush.msrb.mxu3 %v350_v19 }
  0x38   :  { %269 = vmatpush.msrb.mxu3 %v353_v22  ;;  %116 = vmatmul.f32.gmra.mxu0 %v32_v52 }
  0x3a   :  { %270 = vmatpush.msrb.mxu3 %v356_v25 }
  0x3c   :  { %271 = vmatpush.msrb.mxu3 %v359_v28 }
  0x3d   :  { %201 = vmatmul.f32.gmra.mxu2 %v33_v53 }
  0x3e   :  { %160 = vmatmul.f32.gmra.mxu1 %v33_v53  ;;  %272 = vmatpush.msrb.mxu3 %v362_v31 }
  0x40   :  { %273 = vmatpush.msrb.mxu3 %v365_v34  ;;  %119 = vmatmul.f32.gmra.mxu0 %v33_v53 }
  0x42   :  { %274 = vmatpush.msrb.mxu3 %v368_v37 }
  0x44   :  { %275 = vmatpush.msrb.mxu3 %v45_v40 }
  0x45   :  { %204 = vmatmul.f32.gmra.mxu2 %v34_v54 }
  0x46   :  { %163 = vmatmul.f32.gmra.mxu1 %v34_v54  ;;  %276 = vmatpush.msrb.mxu3 %v42_v43 }
  0x48   :  { %277 = vmatpush.msrb.mxu3 %v39_v46  ;;  %122 = vmatmul.f32.gmra.mxu0 %v34_v54 }
  0x49   :  { %172 = vmatmul.f32.vlgmr.msrb.gmra.mxu3 %v37_v51 }
  0x4d   :  { %207 = vmatmul.f32.gmra.mxu2 %v35_v55 }
  0x4e   :  { %166 = vmatmul.f32.gmra.mxu1 %v35_v55 }
  0x50   :  { %125 = vmatmul.f32.gmra.mxu0 %v35_v55 }
  0x55   :  { %210 = vmatmul.f32.gmra.mxu2 %v36_v49 }
  0x56   :  { %169 = vmatmul.f32.gmra.mxu1 %v36_v49 }
  0x5d   :  { %213 = vmatmul.f32.gmra.mxu2 %v37_v51 }
  0xa3   :  { %v152_v58 = vpop.f32.mrf.mxu1 }
  0xa4   :  { %v153_v61 = vadd.f32 %v152_v58, %v412_v57 }
  0xa5   :  { %v111_v62 = vpop.f32.mrf.mxu0 }
  0xa6   :  { %218 = vst [vmem:[%s507_s3 + $0x8] sm:$0xff] %v153_v61  ;;  %v112_v0 = vadd.f32 %v111_v62, %v88_v59 }
  0xa8   :  { %v193_v63 = vpop.f32.mrf.mxu2  ;;  %217 = vst [vmem:[%s507_s3] sm:$0xff] %v112_v0 }
  0xa9   :  { %v194_v1 = vadd.f32 %v193_v63, %v414_v60 }
  0xab   :  { %219 = vst [vmem:[%s507_s3 + $0x10] sm:$0xff] %v194_v1  ;;  %v155_v2 = vpop.f32.mrf.mxu1 }
  0xac   :  { %v156_v3 = vadd.f32 %v155_v2, %v412_v57  ;;  %v129_v5 = vpop.f32.mrf.mxu3 }
  0xad   :  { %v114_v4 = vpop.f32.mrf.mxu0  ;;  %v130_v8 = vadd.f32 %v129_v5, %v88_v59 }
  0xae   :  { %221 = vst [vmem:[%s507_s3 + $0x20] sm:$0xff] %v156_v3  ;;  %v115_v7 = vadd.f32 %v114_v4, %v88_v59 }
  0xaf   :  { %235 = vst [vmem:[%s507_s3 + $0x90] sm:$0xff] %v130_v8 }
  0xb0   :  { %v196_v6 = vpop.f32.mrf.mxu2  ;;  %220 = vst [vmem:[%s507_s3 + $0x18] sm:$0xff] %v115_v7 }
  0xb1   :  { %v197_v9 = vadd.f32 %v196_v6, %v414_v60 }
  0xb3   :  { %222 = vst [vmem:[%s507_s3 + $0x28] sm:$0xff] %v197_v9  ;;  %v158_v10 = vpop.f32.mrf.mxu1 }
  0xb4   :  { %v159_v11 = vadd.f32 %v158_v10, %v412_v57  ;;  %v132_v13 = vpop.f32.mrf.mxu3 }
  0xb5   :  { %v117_v12 = vpop.f32.mrf.mxu0  ;;  %v133_v16 = vadd.f32 %v132_v13, %v88_v59 }
  0xb6   :  { %224 = vst [vmem:[%s507_s3 + $0x38] sm:$0xff] %v159_v11  ;;  %v118_v15 = vadd.f32 %v117_v12, %v88_v59 }
  0xb7   :  { %238 = vst [vmem:[%s507_s3 + $0xa8] sm:$0xff] %v133_v16 }
  0xb8   :  { %v199_v14 = vpop.f32.mrf.mxu2  ;;  %223 = vst [vmem:[%s507_s3 + $0x30] sm:$0xff] %v118_v15 }
  0xb9   :  { %v200_v17 = vadd.f32 %v199_v14, %v414_v60 }
  0xbb   :  { %225 = vst [vmem:[%s507_s3 + $0x40] sm:$0xff] %v200_v17  ;;  %v161_v18 = vpop.f32.mrf.mxu1 }
  0xbc   :  { %v162_v19 = vadd.f32 %v161_v18, %v412_v57 }
  0xbd   :  { %v120_v20 = vpop.f32.mrf.mxu0 }
  0xbe   :  { %227 = vst [vmem:[%s507_s3 + $0x50] sm:$0xff] %v162_v19  ;;  %v121_v22 = vadd.f32 %v120_v20, %v88_v59 }
  0xc0   :  { %v202_v21 = vpop.f32.mrf.mxu2  ;;  %226 = vst [vmem:[%s507_s3 + $0x48] sm:$0xff] %v121_v22 }
  0xc1   :  { %v203_v23 = vadd.f32 %v202_v21, %v414_v60 }
  0xc3   :  { %228 = vst [vmem:[%s507_s3 + $0x58] sm:$0xff] %v203_v23  ;;  %v164_v24 = vpop.f32.mrf.mxu1 }
  0xc4   :  { %v165_v25 = vadd.f32 %v164_v24, %v412_v57 }
  0xc5   :  { %v123_v26 = vpop.f32.mrf.mxu0 }
  0xc6   :  { %230 = vst [vmem:[%s507_s3 + $0x68] sm:$0xff] %v165_v25  ;;  %v124_v28 = vadd.f32 %v123_v26, %v88_v59 }
  0xc8   :  { %v205_v27 = vpop.f32.mrf.mxu2  ;;  %229 = vst [vmem:[%s507_s3 + $0x60] sm:$0xff] %v124_v28 }
  0xc9   :  { %v206_v29 = vadd.f32 %v205_v27, %v414_v60 }
  0xcb   :  { %231 = vst [vmem:[%s507_s3 + $0x70] sm:$0xff] %v206_v29  ;;  %v167_v30 = vpop.f32.mrf.mxu1 }
  0xcc   :  { %v168_v31 = vadd.f32 %v167_v30, %v412_v57  ;;  %v173_v32 = vpop.f32.mrf.mxu3 }
  0xcd   :  { %v174_v33 = vadd.f32 %v173_v32, %v412_v57  ;;  %v126_v34 = vpop.f32.mrf.mxu0 }
  0xce   :  { %233 = vst [vmem:[%s507_s3 + $0x80] sm:$0xff] %v168_v31  ;;  %v127_v36 = vadd.f32 %v126_v34, %v88_v59 }
  0xcf   :  { %239 = vst [vmem:[%s507_s3 + $0xb0] sm:$0xff] %v174_v33 }
  0xd0   :  { %v208_v35 = vpop.f32.mrf.mxu2  ;;  %232 = vst [vmem:[%s507_s3 + $0x78] sm:$0xff] %v127_v36 }
  0xd1   :  { %v209_v37 = vadd.f32 %v208_v35, %v414_v60 }
  0xd3   :  { %234 = vst [vmem:[%s507_s3 + $0x88] sm:$0xff] %v209_v37  ;;  %v170_v38 = vpop.f32.mrf.mxu1 }
  0xd4   :  { %v171_v39 = vadd.f32 %v170_v38, %v412_v57 }
  0xd6   :  { %236 = vst [vmem:[%s507_s3 + $0x98] sm:$0xff] %v171_v39 }
  0xd8   :  { %v211_v40 = vpop.f32.mrf.mxu2 }
  0xd9   :  { %v212_v41 = vadd.f32 %v211_v40, %v414_v60 }
  0xdb   :  { %237 = vst [vmem:[%s507_s3 + $0xa0] sm:$0xff] %v212_v41 }
  0xe0   :  { %v214_v42 = vpop.f32.mrf.mxu2 }
  0xe1   :  { %v215_v43 = vadd.f32 %v214_v42, %v414_v60 }
  0xe3   :  { %240 = vst [vmem:[%s507_s3 + $0xb8] sm:$0xff] %v215_v43 }
  0xe4   :  { %245 = vsyncpa [#allocation3], 1 }

// kernel: vae_decoder_forward.5
= control target key start
LH: loop header
LB: loop body
LE: loop exit
PB: predicated region body
PF: predicated region fallthrough
CT: control target
= control target key end

     0   :  { %8 = vsyncpa [#allocation3], 0  ;;  %s240_s15 = smov [#allocation2]   ;;  %s241_s17 = smov 256   ;;  %s341_s0 = inlined_call_operand.vmem [shape: f32[64,128], index: 0, kind: input, shape index: {}]   ;;  %s342_s1 = inlined_call_operand.hbm [shape: f32[128,256], index: 1, kind: input, shape index: {}]   ;;  %s343_s2 = inlined_call_operand.vmem [shape: f32[1,256], index: 2, kind: input, shape index: {}]   ;;  %s344_s3 = inlined_call_operand.vmem [shape: f32[64,256], index: 3, kind: output, shape index: {}]  }
   0x1   :  { %s15_s14 = sshll.u32 %s342_s1, 4  ;;  %s17_s16 = sshll.u32 %s240_s15, 4  ;;  %s16_s14 = int_to_ptr.hbm [resolvable:$true] %s15_s14  ;;  %s18_s16 = int_to_ptr.vmem [resolvable:$true] %s17_s16 }
   0x2   :  { %s242_s18 = smov 16  }
   0x3   :  { %23 = dma.hbm_to_vmem [thread:$0]  %s16_s14, 4096, %s18_s16, [#allocation3], %s241_s17, %s241_s17, %s242_s18  }
   0x4   :  { %238 = dma.done.wait [#allocation3], 4096  }
   0x5   :  { %239 = vsyncadd [#allocation3], 4294963200  ;;  %v68_v0 = vld [vmem:[#allocation2 + $0xf0] sm:$0xff]  ;;  %v69_v1 = vld [vmem:[#allocation2 + $0xf8] sm:$0xff] }
   0x6   :  { %v66_v2 = vld [vmem:[#allocation2 + $0xe0] sm:$0xff]  ;;  %179 = vmatpush.msra.mxu2 %v68_v0  ;;  %195 = vmatpush.msra.mxu3 %v69_v1  ;;  %v67_v3 = vld [vmem:[#allocation2 + $0xe8] sm:$0xff]  ;;  %v64_v4 = vld [vmem:[#allocation2 + $0xd0] sm:$0xff] }
   0x7   :  { %v65_v5 = vld [vmem:[#allocation2 + $0xd8] sm:$0xff]  ;;  %76 = vmatpush.msra.mxu0 %v68_v0  ;;  %117 = vmatpush.msra.mxu1 %v69_v1  ;;  %v62_v6 = vld [vmem:[#allocation2 + $0xc0] sm:$0xff]  ;;  %v63_v7 = vld [vmem:[#allocation2 + $0xc8] sm:$0xff] }
   0x8   :  { %180 = vmatpush.msra.mxu2 %v66_v2  ;;  %196 = vmatpush.msra.mxu3 %v67_v3  ;;  %v60_v8 = vld [vmem:[#allocation2 + $0xb0] sm:$0xff]  ;;  %v61_v9 = vld [vmem:[#allocation2 + $0xb8] sm:$0xff]  ;;  %v58_v10 = vld [vmem:[#allocation2 + $0xa0] sm:$0xff] }
   0x9   :  { %77 = vmatpush.msra.mxu0 %v66_v2  ;;  %118 = vmatpush.msra.mxu1 %v67_v3  ;;  %v59_v11 = vld [vmem:[#allocation2 + $0xa8] sm:$0xff]  ;;  %v56_v12 = vld [vmem:[#allocation2 + $0x90] sm:$0xff]  ;;  %v57_v13 = vld [vmem:[#allocation2 + $0x98] sm:$0xff] }
   0xa   :  { %181 = vmatpush.msra.mxu2 %v64_v4  ;;  %197 = vmatpush.msra.mxu3 %v65_v5  ;;  %v54_v14 = vld [vmem:[#allocation2 + $0x80] sm:$0xff]  ;;  %v55_v15 = vld [vmem:[#allocation2 + $0x88] sm:$0xff]  ;;  %v52_v16 = vld [vmem:[#allocation2 + $0x70] sm:$0xff] }
   0xb   :  { %78 = vmatpush.msra.mxu0 %v64_v4  ;;  %119 = vmatpush.msra.mxu1 %v65_v5  ;;  %v53_v17 = vld [vmem:[#allocation2 + $0x78] sm:$0xff]  ;;  %v50_v18 = vld [vmem:[#allocation2 + $0x60] sm:$0xff]  ;;  %v51_v19 = vld [vmem:[#allocation2 + $0x68] sm:$0xff] }
   0xc   :  { %182 = vmatpush.msra.mxu2 %v62_v6  ;;  %198 = vmatpush.msra.mxu3 %v63_v7  ;;  %v48_v20 = vld [vmem:[#allocation2 + $0x50] sm:$0xff]  ;;  %v49_v21 = vld [vmem:[#allocation2 + $0x58] sm:$0xff]  ;;  %v46_v22 = vld [vmem:[#allocation2 + $0x40] sm:$0xff] }
   0xd   :  { %79 = vmatpush.msra.mxu0 %v62_v6  ;;  %120 = vmatpush.msra.mxu1 %v63_v7  ;;  %v47_v23 = vld [vmem:[#allocation2 + $0x48] sm:$0xff]  ;;  %v44_v24 = vld [vmem:[#allocation2 + $0x30] sm:$0xff]  ;;  %v45_v25 = vld [vmem:[#allocation2 + $0x38] sm:$0xff] }
   0xe   :  { %183 = vmatpush.msra.mxu2 %v60_v8  ;;  %199 = vmatpush.msra.mxu3 %v61_v9  ;;  %v42_v26 = vld [vmem:[#allocation2 + $0x20] sm:$0xff]  ;;  %v43_v27 = vld [vmem:[#allocation2 + $0x28] sm:$0xff]  ;;  %v40_v28 = vld [vmem:[#allocation2 + $0x10] sm:$0xff] }
   0xf   :  { %80 = vmatpush.msra.mxu0 %v60_v8  ;;  %121 = vmatpush.msra.mxu1 %v61_v9  ;;  %v41_v29 = vld [vmem:[#allocation2 + $0x18] sm:$0xff]  ;;  %v38_v30 = vld [vmem:[#allocation2] sm:$0xff]  ;;  %v39_v31 = vld [vmem:[#allocation2 + $0x8] sm:$0xff] }
  0x10   :  { %184 = vmatpush.msra.mxu2 %v58_v10  ;;  %200 = vmatpush.msra.mxu3 %v59_v11  ;;  %v34_v32 = vld [vmem:[%s341_s0 + $0x20] sm:$0xff]  ;;  %v35_v34 = vld [vmem:[%s341_s0 + $0x28] sm:$0xff]  ;;  %v36_v36 = vld [vmem:[%s341_s0 + $0x30] sm:$0xff] }
  0x11   :  { %81 = vmatpush.msra.mxu0 %v58_v10  ;;  %122 = vmatpush.msra.mxu1 %v59_v11  ;;  %v30_v33 = vld [vmem:[%s341_s0] sm:$0xff]  ;;  %v31_v35 = vld [vmem:[%s341_s0 + $0x8] sm:$0xff]  ;;  %v32_v37 = vld [vmem:[%s341_s0 + $0x10] sm:$0xff] }
  0x12   :  { %185 = vmatpush.msra.mxu2 %v56_v12  ;;  %201 = vmatpush.msra.mxu3 %v57_v13  ;;  %v37_v38 = vld [vmem:[%s341_s0 + $0x38] sm:$0xff]  ;;  %v70_v40 = vld [vmem:[%s343_s2] sm:$0x3] }
  0x13   :  { %82 = vmatpush.msra.mxu0 %v56_v12  ;;  %123 = vmatpush.msra.mxu1 %v57_v13  ;;  %v33_v39 = vld [vmem:[%s341_s0 + $0x18] sm:$0xff]  ;;  %v72_v41 = vperm.slane %v70_v40, 0  ;;  %v73_v42 = vperm.slane %v70_v40, 1 }
  0x14   :  { %186 = vmatpush.msra.mxu2 %v54_v14  ;;  %202 = vmatpush.msra.mxu3 %v55_v15 }
  0x15   :  { %83 = vmatpush.msra.mxu0 %v54_v14  ;;  %124 = vmatpush.msra.mxu1 %v55_v15 }
  0x16   :  { %187 = vmatpush.msra.mxu2 %v52_v16  ;;  %203 = vmatpush.msra.mxu3 %v53_v17 }
  0x17   :  { %84 = vmatpush.msra.mxu0 %v52_v16  ;;  %125 = vmatpush.msra.mxu1 %v53_v17 }
  0x18   :  { %188 = vmatpush.msra.mxu2 %v50_v18  ;;  %204 = vmatpush.msra.mxu3 %v51_v19 }
  0x19   :  { %85 = vmatpush.msra.mxu0 %v50_v18  ;;  %126 = vmatpush.msra.mxu1 %v51_v19 }
  0x1a   :  { %189 = vmatpush.msra.mxu2 %v48_v20  ;;  %205 = vmatpush.msra.mxu3 %v49_v21 }
  0x1b   :  { %86 = vmatpush.msra.mxu0 %v48_v20  ;;  %127 = vmatpush.msra.mxu1 %v49_v21 }
  0x1c   :  { %190 = vmatpush.msra.mxu2 %v46_v22  ;;  %206 = vmatpush.msra.mxu3 %v47_v23 }
  0x1d   :  { %87 = vmatpush.msra.mxu0 %v46_v22  ;;  %128 = vmatpush.msra.mxu1 %v47_v23 }
  0x1e   :  { %191 = vmatpush.msra.mxu2 %v44_v24  ;;  %207 = vmatpush.msra.mxu3 %v45_v25 }
  0x1f   :  { %88 = vmatpush.msra.mxu0 %v44_v24  ;;  %129 = vmatpush.msra.mxu1 %v45_v25 }
  0x20   :  { %192 = vmatpush.msra.mxu2 %v42_v26  ;;  %208 = vmatpush.msra.mxu3 %v43_v27 }
  0x21   :  { %89 = vmatpush.msra.mxu0 %v42_v26  ;;  %130 = vmatpush.msra.mxu1 %v43_v27 }
  0x22   :  { %193 = vmatpush.msra.mxu2 %v40_v28  ;;  %209 = vmatpush.msra.mxu3 %v41_v29 }
  0x23   :  { %90 = vmatpush.msra.mxu0 %v40_v28  ;;  %131 = vmatpush.msra.mxu1 %v41_v29 }
  0x24   :  { %194 = vmatpush.msra.mxu2 %v38_v30  ;;  %210 = vmatpush.msra.mxu3 %v39_v31 }
  0x25   :  { %104 = vmatmul.f32.vlgmr.msra.gmra.mxu2 %v34_v32  ;;  %145 = vmatmul.f32.vlgmr.msra.gmra.mxu3 %v34_v32 }
  0x26   :  { %91 = vmatpush.msra.mxu0 %v38_v30  ;;  %132 = vmatpush.msra.mxu1 %v39_v31 }
  0x27   :  { %92 = vmatmul.f32.vlgmr.msra.gmra.mxu0 %v30_v33  ;;  %133 = vmatmul.f32.vlgmr.msra.gmra.mxu1 %v30_v33 }
  0x2d   :  { %107 = vmatmul.f32.gmra.mxu2 %v35_v34  ;;  %148 = vmatmul.f32.gmra.mxu3 %v35_v34 }
  0x2f   :  { %95 = vmatmul.f32.gmra.mxu0 %v31_v35  ;;  %136 = vmatmul.f32.gmra.mxu1 %v31_v35 }
  0x35   :  { %110 = vmatmul.f32.gmra.mxu2 %v36_v36  ;;  %151 = vmatmul.f32.gmra.mxu3 %v36_v36 }
  0x37   :  { %98 = vmatmul.f32.gmra.mxu0 %v32_v37  ;;  %139 = vmatmul.f32.gmra.mxu1 %v32_v37 }
  0x3d   :  { %113 = vmatmul.f32.gmra.mxu2 %v37_v38  ;;  %154 = vmatmul.f32.gmra.mxu3 %v37_v38 }
  0x3f   :  { %101 = vmatmul.f32.gmra.mxu0 %v33_v39  ;;  %142 = vmatmul.f32.gmra.mxu1 %v33_v39 }
  0xa4   :  { %v93_v43 = vpop.f32.mrf.mxu0  ;;  %v134_v44 = vpop.f32.mrf.mxu1 }
  0xa5   :  { %v94_v45 = vadd.f32 %v93_v43, %v72_v41  ;;  %v135_v46 = vadd.f32 %v134_v44, %v73_v42 }
  0xa7   :  { %158 = vst [vmem:[%s344_s3] sm:$0xff] %v94_v45 }
  0xa8   :  { %v105_v47 = vpop.f32.mrf.mxu2  ;;  %159 = vst [vmem:[%s344_s3 + $0x8] sm:$0xff] %v135_v46  ;;  %v146_v48 = vpop.f32.mrf.mxu3 }
  0xa9   :  { %v106_v49 = vadd.f32 %v105_v47, %v72_v41  ;;  %v147_v50 = vadd.f32 %v146_v48, %v73_v42 }
  0xab   :  { %166 = vst [vmem:[%s344_s3 + $0x40] sm:$0xff] %v106_v49 }
  0xac   :  { %167 = vst [vmem:[%s344_s3 + $0x48] sm:$0xff] %v147_v50  ;;  %v96_v51 = vpop.f32.mrf.mxu0  ;;  %v137_v52 = vpop.f32.mrf.mxu1 }
  0xad   :  { %v97_v53 = vadd.f32 %v96_v51, %v72_v41  ;;  %v138_v54 = vadd.f32 %v137_v52, %v73_v42 }
  0xaf   :  { %160 = vst [vmem:[%s344_s3 + $0x10] sm:$0xff] %v97_v53 }
  0xb0   :  { %v108_v55 = vpop.f32.mrf.mxu2  ;;  %161 = vst [vmem:[%s344_s3 + $0x18] sm:$0xff] %v138_v54  ;;  %v149_v56 = vpop.f32.mrf.mxu3 }
  0xb1   :  { %v109_v57 = vadd.f32 %v108_v55, %v72_v41  ;;  %v150_v58 = vadd.f32 %v149_v56, %v73_v42 }
  0xb3   :  { %168 = vst [vmem:[%s344_s3 + $0x50] sm:$0xff] %v109_v57 }
  0xb4   :  { %169 = vst [vmem:[%s344_s3 + $0x58] sm:$0xff] %v150_v58  ;;  %v99_v59 = vpop.f32.mrf.mxu0  ;;  %v140_v60 = vpop.f32.mrf.mxu1 }
  0xb5   :  { %v100_v61 = vadd.f32 %v99_v59, %v72_v41  ;;  %v141_v62 = vadd.f32 %v140_v60, %v73_v42 }
  0xb7   :  { %162 = vst [vmem:[%s344_s3 + $0x20] sm:$0xff] %v100_v61 }
  0xb8   :  { %v111_v63 = vpop.f32.mrf.mxu2  ;;  %163 = vst [vmem:[%s344_s3 + $0x28] sm:$0xff] %v141_v62  ;;  %v152_v0 = vpop.f32.mrf.mxu3 }
  0xb9   :  { %v112_v1 = vadd.f32 %v111_v63, %v72_v41  ;;  %v153_v2 = vadd.f32 %v152_v0, %v73_v42 }
  0xbb   :  { %170 = vst [vmem:[%s344_s3 + $0x60] sm:$0xff] %v112_v1 }
  0xbc   :  { %171 = vst [vmem:[%s344_s3 + $0x68] sm:$0xff] %v153_v2  ;;  %v102_v3 = vpop.f32.mrf.mxu0  ;;  %v143_v4 = vpop.f32.mrf.mxu1 }
  0xbd   :  { %v103_v5 = vadd.f32 %v102_v3, %v72_v41  ;;  %v144_v6 = vadd.f32 %v143_v4, %v73_v42 }
  0xbf   :  { %164 = vst [vmem:[%s344_s3 + $0x30] sm:$0xff] %v103_v5 }
  0xc0   :  { %v114_v7 = vpop.f32.mrf.mxu2  ;;  %165 = vst [vmem:[%s344_s3 + $0x38] sm:$0xff] %v144_v6  ;;  %v155_v8 = vpop.f32.mrf.mxu3 }
  0xc1   :  { %v115_v9 = vadd.f32 %v114_v7, %v72_v41  ;;  %v156_v10 = vadd.f32 %v155_v8, %v73_v42 }
  0xc3   :  { %172 = vst [vmem:[%s344_s3 + $0x70] sm:$0xff] %v115_v9 }
  0xc4   :  { %173 = vst [vmem:[%s344_s3 + $0x78] sm:$0xff] %v156_v10 }
  0xc5   :  { %178 = vsyncpa [#allocation3], 1 }

</bundles_post_ra>
